<compile_context>
chip_gen: v5e
topology: v5e:2x2
jax: 0.10.0
libtpu: 0.0.40
codegen_flags: <defaults>
</compile_context>

<pallas_src>
import functools

import jax
import jax.numpy as jnp
from jax.experimental import pallas as pl
from jax.experimental.pallas import tpu as pltpu


def _tv_partial_kernel(x_ref, mask_ref, dh_ref, dw_ref, *, w: int):
    """Per-block TV partial sums.

    x_ref:    (TB, H*W) block = TB whole images, spatially flattened.
    mask_ref: (1, H*W-1) {0,1} mask zeroing horizontal pairs that straddle a
              row boundary (position p with p % W == W-1).
    dh_ref:   (1, TB, 1) per-image sum of |vertical diffs| for this block.
    dw_ref:   (1, TB, 1) per-image sum of |horizontal diffs| for this block.
    """
    x = x_ref[...]                                         # (TB, HW), in dtype

    # Vertical neighbours: W apart on the flattened axis, always same image.
    dh = jnp.abs(x[:, w:] - x[:, :-w])                     # (TB, HW - W)
    # Horizontal neighbours: adjacent; kill the (W-1 -> next row) wrap pairs.
    dw = jnp.abs(x[:, 1:] - x[:, :-1]) * mask_ref[...]     # (TB, HW - 1)

    # Cheap per-row (per-image) lane reductions, accumulated in f32.
    dh_ref[0] = jnp.sum(dh, axis=-1, keepdims=True, dtype=jnp.float32)
    dw_ref[0] = jnp.sum(dw, axis=-1, keepdims=True, dtype=jnp.float32)


def tv_loss(x: jax.Array, weight: float = 1.0,
            max_block_bytes: int = 2 * 1024 * 1024) -> jax.Array:
    """Total Variation loss matching PyTorch TVLoss.forward semantics."""
    B, C, H, W = x.shape
    if H < 2 or W < 2:
        raise ValueError("TV loss needs H >= 2 and W >= 2.")
    N = B * C
    HW = H * W

    # Free row-major reshape: lane axis becomes H*W (lane-dense).
    xf = x.reshape(N, HW)

    # Images per block: big enough to amortise per-step overhead, small enough
    # to be VMEM-safe (incl. temporaries + double buffering) on v7x's 64 MiB.
    img_bytes = HW * x.dtype.itemsize
    tb_cap = max(1, max_block_bytes // img_bytes)
    if N <= tb_cap:
        tb = N                                # single block == full array dim
    else:
        tb = max(8, (tb_cap // 8) * 8)        # (8,128) tiling: multiple of 8
    # TODO(synk): for frames too large for even 8 images per block, also tile
    # along H with a one-row halo (v7x VMEM-capping feedback).
    nb = -(-N // tb)
    n_pad = nb * tb
    if n_pad != N:                            # zero images contribute exactly 0
        xf = jnp.pad(xf, ((0, n_pad - N), (0, 0)))

    # {0,1} mask that zeroes horizontal diffs crossing a row boundary.
    pos = jnp.arange(HW - 1, dtype=jnp.int32)
    mask = ((pos % W) != (W - 1)).astype(x.dtype).reshape(1, HW - 1)

    kernel = functools.partial(_tv_partial_kernel, w=W)

    dh_part, dw_part = pl.pallas_call(
        kernel,
        out_shape=(
            jax.ShapeDtypeStruct((nb, tb, 1), jnp.float32),
            jax.ShapeDtypeStruct((nb, tb, 1), jnp.float32),
        ),
        grid_spec=pltpu.PrefetchScalarGridSpec(
            num_scalar_prefetch=0,
            grid=(nb,),
            in_specs=[
                pl.BlockSpec((tb, HW), lambda i: (i, 0)),
                pl.BlockSpec((1, HW - 1), lambda i: (0, 0)),
            ],
            out_specs=[
                pl.BlockSpec((1, tb, 1), lambda i: (i, 0, 0)),
                pl.BlockSpec((1, tb, 1), lambda i: (i, 0, 0)),
            ],
        ),
        compiler_params=pltpu.CompilerParams(
            # No carried state: every step writes its own output block, so the
            # axis is truly parallel (both v7x TensorCores can be used).
            dimension_semantics=("parallel",),
            vmem_limit_bytes=32 * 1024 * 1024,
        ),
    )(xf, mask)

    # Tiny final combine in XLA (padded images contributed zero). Multiply by
    # precomputed reciprocals instead of dividing in the kernel epilogue.
    sum_dh = jnp.sum(dh_part, dtype=jnp.float32)
    sum_dw = jnp.sum(dw_part, dtype=jnp.float32)
    inv_n_dh = 1.0 / float(N * (H - 1) * W)
    inv_n_dw = 1.0 / float(N * H * (W - 1))
    return jnp.float32(weight) * (sum_dh * inv_n_dh + sum_dw * inv_n_dw)


def tv_loss_ref(x: jax.Array, weight: float = 1.0) -> jax.Array:
    """Pure-JAX reference mirroring the PyTorch module."""
    dh = jnp.abs(x[:, :, 1:, :] - x[:, :, :-1, :]).mean()
    dw = jnp.abs(x[:, :, :, 1:] - x[:, :, :, :-1]).mean()
    return weight * (dh + dw)


if __name__ == "__main__":
    # Primary case (NCHW, as implied by the PyTorch module).
    key = jax.random.PRNGKey(0)
    B, C, H, W = 2, 4, 16, 16
    x = jax.random.normal(key, (B, C, H, W), dtype=jnp.float32)
    loss = jax.block_until_ready(tv_loss(x, weight=1.0))
    ref = tv_loss_ref(x, weight=1.0)
    assert jnp.allclose(loss, ref, rtol=1e-5, atol=1e-5), (loss, ref)

    # Odd-shaped case exercising a multi-block grid + zero-image padding.
    x2 = jax.random.normal(jax.random.PRNGKey(0), (3, 3, 24, 20),
                           dtype=jnp.float32)
    loss2 = jax.block_until_ready(
        tv_loss(x2, weight=0.5, max_block_bytes=8 * 24 * 20 * 4))
    ref2 = tv_loss_ref(x2, weight=0.5)
    assert jnp.allclose(loss2, ref2, rtol=1e-5, atol=1e-5), (loss2, ref2)

    print("KERNEL_OK")
</pallas_src>

<mosaic_0001>
module attributes {stable_mosaic.version = 11 : i64} {
  func.func @_tv_partial_kernel(%arg0: i32, %arg1: memref<8x256xf32, #tpu.memory_space<vmem>>, %arg2: memref<1x255xf32, #tpu.memory_space<vmem>>, %arg3: memref<1x8x1xf32, #tpu.memory_space<vmem>>, %arg4: memref<1x8x1xf32, #tpu.memory_space<vmem>>) attributes {dimension_semantics = [#tpu.dimension_semantics<parallel>], iteration_bounds = array<i64: 1>, scalar_prefetch = 0 : i64, scratch_operands = 0 : i64, tpu.core_type = #tpu.core_type<tc>, window_params = [{transform_indices = @transform_0, window_bounds = array<i64: 8, 256>}, {pipeline_mode = #tpu.pipeline_mode<synchronous>, transform_indices = @transform_1, window_bounds = array<i64: 1, 255>}, {transform_indices = @transform_2, window_bounds = array<i64: 1, 8, 1>}, {transform_indices = @transform_3, window_bounds = array<i64: 1, 8, 1>}]} {
    %c0 = arith.constant 0 : index
    %c0_0 = arith.constant 0 : index
    %0 = vector.load %arg1[%c0, %c0_0] : memref<8x256xf32, #tpu.memory_space<vmem>>, vector<8x256xf32>
    %1 = vector.extract_strided_slice %0 {offsets = [0, 16], sizes = [8, 240], strides = [1, 1]} : vector<8x256xf32> to vector<8x240xf32>
    %2 = vector.extract_strided_slice %0 {offsets = [0, 0], sizes = [8, 240], strides = [1, 1]} : vector<8x256xf32> to vector<8x240xf32>
    %3 = arith.subf %1, %2 : vector<8x240xf32>
    %4 = math.absf %3 : vector<8x240xf32>
    %5 = vector.extract_strided_slice %0 {offsets = [0, 1], sizes = [8, 255], strides = [1, 1]} : vector<8x256xf32> to vector<8x255xf32>
    %6 = vector.extract_strided_slice %0 {offsets = [0, 0], sizes = [8, 255], strides = [1, 1]} : vector<8x256xf32> to vector<8x255xf32>
    %7 = arith.subf %5, %6 : vector<8x255xf32>
    %8 = math.absf %7 : vector<8x255xf32>
    %c0_1 = arith.constant 0 : index
    %c0_2 = arith.constant 0 : index
    %9 = vector.load %arg2[%c0_1, %c0_2] : memref<1x255xf32, #tpu.memory_space<vmem>>, vector<1x255xf32>
    %10 = vector.broadcast %9 : vector<1x255xf32> to vector<8x255xf32>
    %11 = arith.mulf %8, %10 : vector<8x255xf32>
    %cst = arith.constant dense<0.000000e+00> : vector<8xf32>
    %12 = vector.multi_reduction <add>, %4, %cst [1] : vector<8x240xf32> to vector<8xf32>
    %13 = vector.shape_cast %12 : vector<8xf32> to vector<8x1xf32>
    %c0_3 = arith.constant 0 : index
    %c0_4 = arith.constant 0 : index
    %c0_5 = arith.constant 0 : index
    %14 = vector.load %arg3[%c0_3, %c0_4, %c0_5] : memref<1x8x1xf32, #tpu.memory_space<vmem>>, vector<1x8x1xf32>
    %15 = vector.shape_cast %14 : vector<1x8x1xf32> to vector<8x1xf32>
    %16 = vector.shape_cast %13 : vector<8x1xf32> to vector<1x8x1xf32>
    tpu.vector_store %arg3[%c0_3, %c0_4, %c0_5], %16 {strides = array<i32>} : memref<1x8x1xf32, #tpu.memory_space<vmem>>, vector<1x8x1xf32>,
    %cst_6 = arith.constant dense<0.000000e+00> : vector<8xf32>
    %17 = vector.multi_reduction <add>, %11, %cst_6 [1] : vector<8x255xf32> to vector<8xf32>
    %18 = vector.shape_cast %17 : vector<8xf32> to vector<8x1xf32>
    %c0_7 = arith.constant 0 : index
    %c0_8 = arith.constant 0 : index
    %c0_9 = arith.constant 0 : index
    %19 = vector.load %arg4[%c0_7, %c0_8, %c0_9] : memref<1x8x1xf32, #tpu.memory_space<vmem>>, vector<1x8x1xf32>
    %20 = vector.shape_cast %19 : vector<1x8x1xf32> to vector<8x1xf32>
    %21 = vector.shape_cast %18 : vector<8x1xf32> to vector<1x8x1xf32>
    tpu.vector_store %arg4[%c0_7, %c0_8, %c0_9], %21 {strides = array<i32>} : memref<1x8x1xf32, #tpu.memory_space<vmem>>, vector<1x8x1xf32>,
    return
  }
  func.func @transform_0(%arg0: i32) -> (i32, i32) {
    %c0_i32 = arith.constant 0 : i32
    %c0_i32_0 = arith.constant 0 : i32
    return %arg0, %c0_i32 : i32, i32
  }
  func.func @transform_1(%arg0: i32) -> (i32, i32) {
    %c0_i32 = arith.constant 0 : i32
    %c0_i32_0 = arith.constant 0 : i32
    %c0_i32_1 = arith.constant 0 : i32
    return %c0_i32, %c0_i32_0 : i32, i32
  }
  func.func @transform_2(%arg0: i32) -> (i32, i32, i32) {
    %c0_i32 = arith.constant 0 : i32
    %c0_i32_0 = arith.constant 0 : i32
    %c0_i32_1 = arith.constant 0 : i32
    return %arg0, %c0_i32, %c0_i32_0 : i32, i32, i32
  }
  func.func @transform_3(%arg0: i32) -> (i32, i32, i32) {
    %c0_i32 = arith.constant 0 : i32
    %c0_i32_0 = arith.constant 0 : i32
    %c0_i32_1 = arith.constant 0 : i32
    return %arg0, %c0_i32, %c0_i32_0 : i32, i32, i32
  }
}

</mosaic_0001>

<bundles_post_ra>
// kernel: tpu_custom_call.1
= control target key start
LH: loop header
LB: loop body
LE: loop exit
PB: predicated region body
PF: predicated region fallthrough
CT: control target
= control target key end

     0   :  { %9 = vsyncpa [#allocation3], 0  ;;  %s222_s0 = inlined_call_operand.hbm [shape: f32[8,256], index: 0, kind: input, shape index: {}]   ;;  %s223_s1 = inlined_call_operand.hbm [shape: f32[1,255], index: 1, kind: input, shape index: {}]   ;;  %s224_s2 = inlined_call_operand.vmem [shape: f32[1,8,1], index: 2, kind: output, shape index: {0}]   ;;  %s225_s3 = inlined_call_operand.vmem [shape: f32[1,8,1], index: 3, kind: output, shape index: {1}]  }
   0x1   :  { %s16_s14 = sshll.u32 %s222_s0, 4  ;;  %s17_s14 = int_to_ptr.hbm [resolvable:$true] %s16_s14 }
   0x2   :  { %10 = vsyncpa [#allocation5], 0  ;;  %s180_s15 = smov [#allocation2]   ;;  %s27_s19 = sshll.u32 %s223_s1, 4  ;;  %s28_s19 = int_to_ptr.hbm [resolvable:$true] %s27_s19 }
   0x3   :  { %s18_s16 = sshll.u32 %s180_s15, 4  ;;  %s181_s20 = smov [#allocation4]   ;;  %s19_s16 = int_to_ptr.vmem [resolvable:$true] %s18_s16 }
   0x4   :  { %21 = dma.hbm_to_vmem [thread:$0]  %s17_s14, 256, %s19_s16, [#allocation3]  }
   0x5   :  { %s29_s21 = sshll.u32 %s181_s20, 4  ;;  %s30_s21 = int_to_ptr.vmem [resolvable:$true] %s29_s21 }
   0x6   :  { %32 = dma.hbm_to_vmem [thread:$0]  %s28_s19, 32, %s30_s21, [#allocation5]  }
   0x7   :  { %176 = dma.done.wait [#allocation3], 256  }
   0x8   :  { %177 = vsyncadd [#allocation3], 4294967040 }
   0x9   :  { %178 = dma.done.wait [#allocation5], 32  }
   0xa   :  { %179 = vsyncadd [#allocation5], 4294967264  ;;  %v41_v0 = vld [vmem:[#allocation2] sm:$0xff]  ;;  %v69_v1 = vld [vmem:[#allocation4] sm:$0x3]  ;;  %s182_s0 = smov 16  }
   0xb   :  { %45 = vrot.lane.b32.xlu1 %v41_v0, %s182_s0  ;;  %s183_s22 = smov 1   ;;  %v71_v2 = vperm.slane %v69_v1, 0  ;;  %v42_v3 = vld [vmem:[#allocation2 + $0x8] sm:$0xff]  ;;  %v72_v4 = vperm.slane %v69_v1, 1  ;;  %s184_s1 = smov 112   ;;  %vm49_vm0 = vcmask 130048  }
   0xc   :  { %57 = vrot.lane.b32.xlu0 %v41_v0, %s183_s22  ;;  %s185_s23 = smov 127   ;;  %vm61_vm1 = vcmask 7168   ;;  %vm88_vm2 = vcmask 916480   ;;  %vm103_vm3 = vcmask 1039360  }
   0xd   :  { %73 = vrot.lane.b32.xlu2 %v71_v2, %s183_s22 }
  0x13   :  { %47 = vrot.lane.b32.xlu1 %v42_v3, %s182_s0 }
  0x14   :  { %59 = vrot.lane.b32.xlu0 %v42_v3, %s183_s22 }
  0x15   :  { %75 = vrot.lane.b32.xlu2 %v72_v4, %s183_s22 }
  0x67   :  { %v74_v5 = vpop.permute.xlu2 %73 }
  0x6f   :  { %v76_v17 = vpop.permute.xlu2 %75 }
  0x70   :  { %v77_v22 = vsel %vm61_vm1, %v74_v5, %v76_v17 }
  0x7d   :  { %v46_v6 = vpop.permute.xlu1 %45 }
  0x7e   :  { %v58_v7 = vpop.permute.xlu0 %57  ;;  %v53_v8 = vsub.f32 %v41_v0, %v46_v6 }
  0x7f   :  { %v65_v9 = vsub.f32 %v41_v0, %v58_v7 }
  0x80   :  { %v55_v10 = vand.u32 2147483647, %v53_v8 }
  0x81   :  { %v67_v11 = vand.u32 2147483647, %v65_v9 }
  0x82   :  { %84 = vrot.lane.b32.xlu0 %v55_v10, %s184_s1 }
  0x83   :  { %v80_v12 = vmul.f32 %v74_v5, %v67_v11 }
  0x85   :  { %99 = vrot.lane.b32.xlu2 %v80_v12, %s185_s23  ;;  %v48_v13 = vpop.permute.xlu1 %47 }
  0x86   :  { %v60_v14 = vpop.permute.xlu0 %59  ;;  %v50_v15 = vsel %vm49_vm0, %v46_v6, %v48_v13 }
  0x87   :  { %v62_v16 = vsel %vm61_vm1, %v58_v7, %v60_v14  ;;  %v54_v18 = vsub.f32 %v42_v3, %v50_v15 }
  0x88   :  { %v66_v19 = vsub.f32 %v42_v3, %v62_v16 }
  0x89   :  { %v56_v20 = vand.u32 2147483647, %v54_v18 }
  0x8a   :  { %v68_v21 = vand.u32 2147483647, %v66_v19 }
  0x8b   :  { %86 = vrot.lane.b32.xlu1 %v56_v20, %s184_s1 }
  0x8c   :  { %v81_v23 = vmul.f32 %v77_v22, %v68_v21 }
  0x8e   :  { %101 = vrot.lane.b32.xlu0 %v81_v23, %s185_s23 }
  0xdf   :  { %v100_v28 = vpop.permute.xlu2 %99 }
  0xf4   :  { %v85_v24 = vpop.permute.xlu0 %84 }
  0xfd   :  { %v87_v25 = vpop.permute.xlu1 %86 }
  0xfe   :  { %v89_v26 = vsel %vm88_vm2, %v85_v24, %v87_v25  ;;  %v92_v27 = vsel %vm88_vm2, %v87_v25, 0.0 }
  0xff   :  { %v93_v30 = vadd.f32 %v92_v27, %v89_v26 }
 0x100   :  { %v102_v29 = vpop.permute.xlu0 %101 }
 0x101   :  { %v104_v31 = vsel %vm103_vm3, %v100_v28, %v102_v29  ;;  %v107_v32 = vsel %vm103_vm3, %v102_v29, 0.0  ;;  %94 = vadd.xlane.f32.xlu1 %v93_v30 }
 0x102   :  { %v108_v33 = vadd.f32 %v107_v32, %v104_v31 }
 0x104   :  { %109 = vadd.xlane.f32.xlu2 %v108_v33 }
 0x174   :  { %v95_v34 = vpop.xlane.xlu1 %94 }
 0x175   :  { %96 = vst.msk [vmem:[%s224_s2] sm:$0xff] %vm61_vm1, %v95_v34 }
 0x177   :  { %v110_v35 = vpop.xlane.xlu2 %109 }
 0x178   :  { %111 = vst.msk [vmem:[%s225_s3] sm:$0xff] %vm61_vm1, %v110_v35 }
 0x179   :  { %120 = vsyncpa [#allocation3], 1 }
 0x17a   :  { %121 = vsyncpa [#allocation5], 1 }

</bundles_post_ra>
